<compile_context>
chip_gen: v7x
topology: tpu7x:2x2x1
jax: 0.10.0
libtpu: 0.0.40
codegen_flags: <defaults>
</compile_context>

<pallas_src>
import functools
import math

import jax
import jax.numpy as jnp
from jax.experimental import pallas as pl
from jax.experimental.pallas import tpu as pltpu

_MIB = 1024 * 1024

# Below this minor-dim size the output blocks of the tiled transpose are
# lane-sparse (masked partial vst) -- XLA wins for large arrays in that regime.
_MIN_TRANSPOSE_DIM = 128
# ... but tiny arrays stay on the Pallas path regardless (perf is irrelevant,
# and the full-dim blocks are still (8,128)-legal).
_TINY_BYTES = 2 * _MIB
# Whole-array single-step Pallas fallback for general permutations is only used
# when input (and output) comfortably fit VMEM on every TPU generation.
_SMALL_WHOLE_ARRAY_BYTES = 4 * _MIB


def _coalesce(shape, perm):
    """Merge adjacent input axes that remain adjacent & in-order in the output."""
    runs = []  # in OUTPUT order; each run is a list of consecutive input axes
    for a in perm:
        if runs and a == runs[-1][-1] + 1:
            runs[-1].append(a)
        else:
            runs.append([a])
    runs_in_input_order = sorted(runs, key=lambda r: r[0])
    red_in_shape = tuple(math.prod(shape[a] for a in r) for r in runs_in_input_order)
    run_to_idx = {tuple(r): i for i, r in enumerate(runs_in_input_order)}
    red_perm = tuple(run_to_idx[tuple(r)] for r in runs)
    return red_in_shape, red_perm


def _vmem_capacity_bytes():
    """Physical VMEM per TensorCore (128 MiB v5e/v6e, 64 MiB v7x)."""
    try:
        return int(pltpu.get_tpu_info().vmem_capacity_bytes)
    except Exception:
        return 128 * _MIB  # conservative only for the *ceiling*; blocks are small anyway


def _tile_cap(itemsize):
    """Per-side tile cap: ~4 MiB per block, <= 1024, always a multiple of 128."""
    block_budget = 4 * _MIB
    cap = 1024
    while cap > 128 and cap * cap * itemsize > block_budget:
        cap //= 2
    return cap


def _pick_tile(dim, cap):
    """Full dim if it fits the cap (lane-dense, no ragged edge); else the cap
    (a multiple of 128 -- ragged edges handled by a pl.cdiv grid)."""
    return dim if dim <= cap else cap


def _transpose2d_kernel(x_ref, o_ref):
    # x_ref: (tp, tq), o_ref: (tq, tp).  Clean 2D sublane<->lane transpose (XLU).
    # TODO(synk): if a v7x bundle dump shows the vector-extended (XLU) slot is the
    # binding slot for bf16/int8 inputs, pack pairs into 32-bit containers with
    # pltpu.bitcast before the transpose and unpack after.
    o_ref[...] = x_ref[...].T


def _batched_transpose(x3):
    """(B, P, Q) -> (B, Q, P) via a tiled, pipelined Pallas kernel."""
    B, P, Q = x3.shape
    itemsize = jnp.dtype(x3.dtype).itemsize
    cap = _tile_cap(itemsize)
    tp = _pick_tile(P, cap)
    tq = _pick_tile(Q, cap)
    n_p = pl.cdiv(P, tp)
    n_q = pl.cdiv(Q, tq)

    # Double-buffered input + output blocks = the pipelined footprint (~16 MiB at
    # the 1024x1024 f32 cap).  Request headroom above it but never approach the
    # physical VMEM ceiling (critical on v7x's 64 MiB per TensorCore).
    pipelined = 2 * (tp * tq + tq * tp) * itemsize
    ceiling = max(_vmem_capacity_bytes() - 16 * _MIB, pipelined + 8 * _MIB)
    vmem_limit = int(min(max(2 * pipelined, 32 * _MIB), ceiling))

    # Innermost grid axis walks the input's contiguous Q dim (sequential HBM
    # reads).  Swapping jp/iq innermost is a free one-line sweep if needed.
    grid = (B, n_p, n_q)
    # Optional sweep: pipeline_mode=pl.Buffered(3) on in_spec to hide DMA jitter.
    in_spec = pl.BlockSpec((pl.Squeezed(), tp, tq), lambda b, jp, iq: (b, jp, iq))
    out_spec = pl.BlockSpec((pl.Squeezed(), tq, tp), lambda b, jp, iq: (b, iq, jp))

    return pl.pallas_call(
        _transpose2d_kernel,
        out_shape=jax.ShapeDtypeStruct((B, Q, P), x3.dtype),
        grid_spec=pltpu.PrefetchScalarGridSpec(
            num_scalar_prefetch=0,
            grid=grid,
            in_specs=[in_spec],
            out_specs=out_spec,
        ),
        compiler_params=pltpu.CompilerParams(
            dimension_semantics=("parallel", "parallel", "parallel"),
            vmem_limit_bytes=vmem_limit,
        ),
        cost_estimate=pl.CostEstimate(
            flops=0, transcendentals=0, bytes_accessed=2 * x3.size * itemsize
        ),
    )(x3)


def _full_permute_kernel(x_ref, o_ref, *, perm):
    o_ref[...] = jnp.transpose(x_ref[...], perm)


def _full_permute_small(xr, red_perm):
    """Single-step whole-array Pallas permute; only for arrays <= 4 MiB so the
    input + output always fit VMEM on every generation (incl. v7x's 64 MiB)."""
    out_shape = tuple(xr.shape[a] for a in red_perm)
    itemsize = jnp.dtype(xr.dtype).itemsize
    vmem_limit = int(min(32 * _MIB, max(16 * _MIB, 6 * xr.size * itemsize)))
    return pl.pallas_call(
        functools.partial(_full_permute_kernel, perm=red_perm),
        out_shape=jax.ShapeDtypeStruct(out_shape, xr.dtype),
        compiler_params=pltpu.CompilerParams(vmem_limit_bytes=vmem_limit),
        cost_estimate=pl.CostEstimate(
            flops=0, transcendentals=0, bytes_accessed=2 * xr.size * itemsize
        ),
    )(xr)


def axis_swap(x, axis):
    """Pallas equivalent of torch `v.permute(*axis)`."""
    perm = tuple(int(a) for a in axis)
    ndim = x.ndim
    assert sorted(perm) == list(range(ndim)), "axis must be a permutation of range(ndim)"

    if perm == tuple(range(ndim)):  # identity (also covers ndim <= 1)
        return x

    out_shape = tuple(x.shape[a] for a in perm)
    nbytes = x.size * jnp.dtype(x.dtype).itemsize

    # Canonicalize: merge axes that move together (metadata-only reshape on a
    # contiguous input; the output reshape below is equally metadata-only).
    red_in_shape, red_perm = _coalesce(x.shape, perm)
    xr = x.reshape(red_in_shape)

    if red_perm == (1, 0):
        x3 = xr.reshape((1,) + red_in_shape)
    elif red_perm == (0, 2, 1):
        x3 = xr
    else:
        x3 = None

    if x3 is not None and (
        min(x3.shape[1], x3.shape[2]) >= _MIN_TRANSPOSE_DIM or nbytes <= _TINY_BYTES
    ):
        # Tiled, pipelined batched 2D transpose (the optimized Pallas path).
        outr = _batched_transpose(x3)
    elif nbytes <= _SMALL_WHOLE_ARRAY_BYTES:
        # Small general permutation: single-step Pallas kernel, whole array in VMEM.
        outr = _full_permute_small(xr, red_perm)
    else:
        # Large general permutation, or large lane-sparse (min(P, Q) < 128)
        # transpose where masked partial stores would dominate: XLA's native
        # transpose beats a mis-tiled Pallas kernel here.
        # TODO(synk): tiled Pallas path for general / narrow-minor permutations.
        outr = jnp.transpose(xr, red_perm)

    return outr.reshape(out_shape)


if __name__ == "__main__":
    key = jax.random.PRNGKey(0)
    k1, k2, k3, k4 = jax.random.split(key, 4)

    # 1) Small NCHW -> NHWC, the typical AxisSwapModule(0, 2, 3, 1) use.
    axis = (0, 2, 3, 1)
    x1 = jax.random.normal(k1, (2, 4, 16, 16), dtype=jnp.float32)
    out1 = jax.block_until_ready(axis_swap(x1, axis))
    ref1 = jnp.transpose(x1, axis)
    assert out1.shape == ref1.shape and out1.dtype == ref1.dtype
    assert bool(jnp.array_equal(out1, ref1)), "Pallas permute mismatch (small NCHW->NHWC)"

    # 2) Larger, tile-aligned case exercising the pipelined tiled path
    #    (reduced problem (2, 256, 4096): full-P 256 x 1024 blocks, 4 Q-steps).
    x2 = jax.random.normal(k2, (2, 256, 64, 64), dtype=jnp.float32)
    out2 = jax.block_until_ready(axis_swap(x2, axis))
    assert bool(jnp.array_equal(out2, jnp.transpose(x2, axis))), "mismatch (tiled case)"

    # 3) Ragged Q (1100 = 1024 + 76): exercises the pl.cdiv grid with a masked
    #    boundary block instead of a whole-dim fallback tile.
    x3 = jax.random.normal(k3, (1, 200, 1100), dtype=jnp.float32)
    out3 = jax.block_until_ready(axis_swap(x3, (0, 2, 1)))
    assert bool(jnp.array_equal(out3, jnp.transpose(x3, (0, 2, 1)))), "mismatch (ragged case)"

    # 4) Plain 2D transpose.
    x4 = jax.random.normal(k4, (256, 384), dtype=jnp.float32)
    out4 = jax.block_until_ready(axis_swap(x4, (1, 0)))
    assert bool(jnp.array_equal(out4, x4.T)), "mismatch (2D transpose)"

    print("KERNEL_OK")
</pallas_src>

<mosaic_0001>
module attributes {stable_mosaic.version = 11 : i64} {
  func.func @_transpose2d_kernel(%arg0: i32, %arg1: i32, %arg2: i32, %arg3: memref<1x4x256xf32, #tpu.memory_space<vmem>>, %arg4: memref<1x256x4xf32, #tpu.memory_space<vmem>>) attributes {dimension_semantics = [#tpu.dimension_semantics<parallel>, #tpu.dimension_semantics<parallel>, #tpu.dimension_semantics<parallel>], iteration_bounds = array<i64: 2, 1, 1>, scalar_prefetch = 0 : i64, scratch_operands = 0 : i64, tpu.core_type = #tpu.core_type<tc>, window_params = [{transform_indices = @transform_0, window_bounds = array<i64: 1, 4, 256>}, {transform_indices = @transform_1, window_bounds = array<i64: 1, 256, 4>}]} {
    %c0 = arith.constant 0 : index
    %c0_0 = arith.constant 0 : index
    %c0_1 = arith.constant 0 : index
    %0 = vector.load %arg3[%c0, %c0_0, %c0_1] : memref<1x4x256xf32, #tpu.memory_space<vmem>>, vector<1x4x256xf32>
    %1 = vector.shape_cast %0 : vector<1x4x256xf32> to vector<4x256xf32>
    %2 = tpu.transpose %1, [1, 0] : vector<4x256xf32> -> vector<256x4xf32>
    %c0_2 = arith.constant 0 : index
    %c0_3 = arith.constant 0 : index
    %c0_4 = arith.constant 0 : index
    %3 = vector.load %arg4[%c0_2, %c0_3, %c0_4] : memref<1x256x4xf32, #tpu.memory_space<vmem>>, vector<1x256x4xf32>
    %4 = vector.shape_cast %3 : vector<1x256x4xf32> to vector<256x4xf32>
    %5 = vector.shape_cast %2 : vector<256x4xf32> to vector<1x256x4xf32>
    tpu.vector_store %arg4[%c0_2, %c0_3, %c0_4], %5 {strides = array<i32>} : memref<1x256x4xf32, #tpu.memory_space<vmem>>, vector<1x256x4xf32>,
    return
  }
  func.func @transform_0(%arg0: i32, %arg1: i32, %arg2: i32) -> (i32, i32, i32) {
    %c0_i32 = arith.constant 0 : i32
    return %arg0, %arg1, %arg2 : i32, i32, i32
  }
  func.func @transform_1(%arg0: i32, %arg1: i32, %arg2: i32) -> (i32, i32, i32) {
    %c0_i32 = arith.constant 0 : i32
    return %arg0, %arg2, %arg1 : i32, i32, i32
  }
}

</mosaic_0001>

<bundles_post_ra>
// kernel: tpu_custom_call.1
= control target key start
LH: loop header
LB: loop body
LE: loop exit
PB: predicated region body
PF: predicated region fallthrough
CT: control target
= control target key end

     0   :  { %6 = vsyncpa [#allocation3], 0  ;;  %s749_s0 = inlined_call_operand.hbm [shape: f32[2,4,256], index: 0, kind: input, shape index: {}]   ;;  %s750_s1 = inlined_call_operand.vmem [shape: f32[2,256,4], index: 1, kind: output, shape index: {}]  }
   0x1   :  { %8 = vsyncpa [#allocation3 + $0x1], 0  ;;  %s558_s6 = smov 0   ;;  %s560_s7 = smov 0  }
   0x2   :  { %s562_s8 = smov 0   ;;  %s564_s9 = smov 0  }
   0x3   :  { %s566_s10 = smov 0   ;;  %s568_s11 = smov 0  }
   0x4 LB: > { %s393_s12 = sadd.s32 4294967295, %s545_s11   ;;  %s33_s13 = sadd.s32 1, %s541_s10  ;;  %s545_s11 = sphi %s568_s11, %s14_s11   ;;  %s541_s10 = sphi %s566_s10, %s760_s10   ;;  %s537_s9 = sphi %s564_s9, %s759_s9   ;;  %s533_s8 = sphi %s562_s8, %s758_s8   ;;  %s529_s7 = sphi %s560_s7, %s757_s7   ;;  %s525_s6 = sphi %s558_s6, %s756_s6  }
   0x5   : > { %p35_p0 = scmp.ge.s32.totalorder %s33_s13, 2  ;;  %s44_s14 = sadd.s32 1, %s533_s8 }
   0x6   : > { %p51_p1 = scmp.ne.s32.totalorder %s533_s8, %s529_s7  ;;  %p52_p2 = scmp.eq.s32.totalorder %s545_s11, 0 }
   0x7   : > { %s762_s13 = smov (%p35_p0, %s33_s13), 0  ;;  %p57_p4 = scmp.ne.s32.totalorder %s529_s7, %s525_s6 }
   0x8   : > { %p594_p3 = por %p52_p2, %p51_p1  ;;  %s37_s16 = ssub.s32 %s541_s10, %s762_s13 }
   0x9   : > { %p58_p5 = scmp.eq.s32.totalorder %s393_s12, 0  ;;  %p42_p6 = scmp.eq.s32.totalorder %s37_s16, 0 }
   0xa   : > { %p414_p8 = scmp.lt.s32.totalorder %s545_s11, 2  ;;  %s111_s19 = sand.u32 1, %s533_s8  }
   0xb   : > { %p601_p7 = por %p58_p5, %p57_p4  ;;  %s406_s20 = sshll.u32 %s541_s10, 7 }
   0xc   : > { %s607_s18 = scalar_select %p42_p6, %s533_s8, %s44_s14  }
   0xd   : > { %s397_s21 = sshll.u32 %s111_s19, 3  ;;  %s614_s24 = scalar_lea.hbm %s749_s0, %s406_s20 }
   0xe   : > { %s115_s25 = scalar_lea.vmem [#allocation2], %s397_s21  ;;  %p618_p9 = pnand %p414_p8, %p594_p3 }
   0xf   : > { %s127_s26 = sshll.u32 %s115_s25, 4  ;;  %s112_s28 = scalar_lea.sflag [#allocation3], %s111_s19  ;;  %s622_s26 = int_to_ptr.vmem [resolvable:$true] %s127_s26 }
  0x10   : > { %s465_s29 = scalar_lea.hbm %s614_s24, 128  ;;  %p467_p13 = pneg %p618_p9 }
  0x11   : > { %p466_p12 = scmp.ne.s32.totalorder %s614_s24, %s465_s29  ;;  %s470_s3 = scalar_lea.hbm %s749_s0, 256 }
  0x12   : > { %p471_p2 = scmp.lt.u32.totalorder %s614_s24, %s749_s0  ;;  %p472_p3 = scmp.lt.u32.totalorder %s470_s3, %s465_s29 }
  0x13   : > { %p468_p0 = pnand %p467_p13, %p466_p12  ;;  %p474_p5 = scmp.lt.u32.totalorder %s465_s29, %s614_s24 }
  0x14   : > { %p473_p4 = por %p472_p3, %p471_p2 }
  0x15   : > { %p469_p1 = pneg %p468_p0 }
  0x16   : > { %p475_p6 = por %p474_p5, %p473_p4 }
  0x18   : > { %p476_p8 = pnand %p475_p6, %p469_p1 }
  0x1a   : > { %479 = shalt.err (!%p476_p8)
}
  0x1b   : > { %s480_s6 = scalar_lea.vmem %s622_s26, 128  ;;  %s547_s12 = smov [#allocation2]  }
  0x1c   : > { %p481_p12 = scmp.ne.s32.totalorder %s622_s26, %s480_s6  ;;  %s485_s14 = sshll.u32 %s547_s12, 4  ;;  %s486_s14 = int_to_ptr.vmem [resolvable:$false] %s485_s14 }
  0x1d   : > { %s487_s15 = scalar_lea.vmem %s486_s14, 256  ;;  %p488_p11 = scmp.lt.s32.totalorder %s622_s26, %s486_s14 }
  0x1e   : > { %p483_p0 = pnand %p481_p12, %p467_p13  ;;  %p489_p2 = scmp.lt.s32.totalorder %s487_s15, %s480_s6 }
  0x20   : > { %p484_p10 = pneg %p483_p0  ;;  %p490_p3 = por %p489_p2, %p488_p11 }
  0x22   : > { %p491_p4 = pnand %p490_p3, %p484_p10 }
  0x24   : > { %494 = shalt.err (!%p491_p4)
}
  0x25   : > { %413 = dma.hbm_to_vmem [thread:$0]  (!%p618_p9), %s614_s24, 128, %s622_s26, %s112_s28  }
  0x26   : > { %p754_p1 = scmp.lt.s32.totalorder %s545_s11, 3  ;;  %p755_p5 = scmp.ge.s32.totalorder %s545_s11, 1 }
  0x28   : > { %p133_p13 = pnand %p755_p5, %p754_p1 }
  0x29   : > { %s138_s16 = sand.u32 (!%p133_p13), 1, %s529_s7  }
  0x2a   : > { %136 = sbr.rel (%p133_p13) target bundleno = 305 (0x131), region = 24  ;;  %s401_s19 = sshll.u32 (!%p133_p13), %s138_s16, 3 }
  0x2b   : > { %s139_s20 = scalar_lea.sflag (!%p133_p13), [#allocation3], %s138_s16  ;;  %s142_s21 = scalar_lea.vmem (!%p133_p13), [#allocation2], %s401_s19 }
  0x31   : > { %520 = dma.done.wait (%p601_p7), %s139_s20, 128  }
  0x32   : > { %522 = vsyncadd (%p601_p7), %s139_s20, 4294967168  ;;  %v182_v0 = vld [vmem:[%s142_s21] sm:$0xff]  ;;  %p170_p9 = scmp.lt.s32.totalorder %s537_s9, 1  ;;  %vm250_vm0 = vcmask 31744  }
  0x33   : > { %186 = vxpose.xlu0.b32.start.end [1/1] (short) %v182_v0, 128  ;;  %v184_v1 = vcombine.high %v182_v0, %v182_v0 }
  0x34   : > { %s764_s9 = smov (!%p170_p9, %s537_s9), 1 }
  0x35   : > { %s407_s22 = sshll.u32 %s764_s9, 8 }
  0x36   : > { %s665_s25 = scalar_lea.vmem %s750_s1, %s407_s22 }
  0x70   : > { %218 = vxpose.xlu0.b32.start.end [1/1] (short) %v184_v1, 128 }
  0xb3   : > { %v202_v2 = vpop.trf.xlu0 }
  0xb4   : > { %251 = vst.msk [vmem:[%s665_s25] sm:$0xff] %vm250_vm0, %v202_v2 }
  0xb7   : > { %v203_v3 = vpop.trf.xlu0 }
  0xb8   : > { %252 = vst.msk [vmem:[%s665_s25 + $0x8] sm:$0xff] %vm250_vm0, %v203_v3 }
  0xbb   : > { %v204_v4 = vpop.trf.xlu0 }
  0xbc   : > { %253 = vst.msk [vmem:[%s665_s25 + $0x10] sm:$0xff] %vm250_vm0, %v204_v4 }
  0xbf   : > { %v205_v5 = vpop.trf.xlu0 }
  0xc0   : > { %254 = vst.msk [vmem:[%s665_s25 + $0x18] sm:$0xff] %vm250_vm0, %v205_v5 }
  0xc3   : > { %v206_v6 = vpop.trf.xlu0 }
  0xc4   : > { %255 = vst.msk [vmem:[%s665_s25 + $0x20] sm:$0xff] %vm250_vm0, %v206_v6 }
  0xc7   : > { %v207_v7 = vpop.trf.xlu0 }
  0xc8   : > { %256 = vst.msk [vmem:[%s665_s25 + $0x28] sm:$0xff] %vm250_vm0, %v207_v7 }
  0xcb   : > { %v208_v8 = vpop.trf.xlu0 }
  0xcc   : > { %257 = vst.msk [vmem:[%s665_s25 + $0x30] sm:$0xff] %vm250_vm0, %v208_v8 }
  0xcf   : > { %v209_v9 = vpop.trf.xlu0 }
  0xd0   : > { %258 = vst.msk [vmem:[%s665_s25 + $0x38] sm:$0xff] %vm250_vm0, %v209_v9 }
  0xd3   : > { %v210_v10 = vpop.trf.xlu0 }
  0xd4   : > { %259 = vst.msk [vmem:[%s665_s25 + $0x40] sm:$0xff] %vm250_vm0, %v210_v10 }
  0xd7   : > { %v211_v11 = vpop.trf.xlu0 }
  0xd8   : > { %260 = vst.msk [vmem:[%s665_s25 + $0x48] sm:$0xff] %vm250_vm0, %v211_v11 }
  0xdb   : > { %v212_v12 = vpop.trf.xlu0 }
  0xdc   : > { %261 = vst.msk [vmem:[%s665_s25 + $0x50] sm:$0xff] %vm250_vm0, %v212_v12 }
  0xdf   : > { %v213_v13 = vpop.trf.xlu0 }
  0xe0   : > { %262 = vst.msk [vmem:[%s665_s25 + $0x58] sm:$0xff] %vm250_vm0, %v213_v13 }
  0xe3   : > { %v214_v14 = vpop.trf.xlu0 }
  0xe4   : > { %263 = vst.msk [vmem:[%s665_s25 + $0x60] sm:$0xff] %vm250_vm0, %v214_v14 }
  0xe7   : > { %v215_v15 = vpop.trf.xlu0 }
  0xe8   : > { %264 = vst.msk [vmem:[%s665_s25 + $0x68] sm:$0xff] %vm250_vm0, %v215_v15 }
  0xeb   : > { %v216_v16 = vpop.trf.xlu0 }
  0xec   : > { %265 = vst.msk [vmem:[%s665_s25 + $0x70] sm:$0xff] %vm250_vm0, %v216_v16 }
  0xef   : > { %v217_v17 = vpop.trf.xlu0 }
  0xf0   : > { %266 = vst.msk [vmem:[%s665_s25 + $0x78] sm:$0xff] %vm250_vm0, %v217_v17 }
  0xf3   : > { %v234_v18 = vpop.trf.xlu0 }
  0xf4   : > { %267 = vst.msk [vmem:[%s665_s25 + $0x80] sm:$0xff] %vm250_vm0, %v234_v18 }
  0xf7   : > { %v235_v19 = vpop.trf.xlu0 }
  0xf8   : > { %268 = vst.msk [vmem:[%s665_s25 + $0x88] sm:$0xff] %vm250_vm0, %v235_v19 }
  0xfb   : > { %v236_v20 = vpop.trf.xlu0 }
  0xfc   : > { %269 = vst.msk [vmem:[%s665_s25 + $0x90] sm:$0xff] %vm250_vm0, %v236_v20 }
  0xff   : > { %v237_v21 = vpop.trf.xlu0 }
 0x100   : > { %270 = vst.msk [vmem:[%s665_s25 + $0x98] sm:$0xff] %vm250_vm0, %v237_v21 }
 0x103   : > { %v238_v22 = vpop.trf.xlu0 }
 0x104   : > { %271 = vst.msk [vmem:[%s665_s25 + $0xa0] sm:$0xff] %vm250_vm0, %v238_v22 }
 0x107   : > { %v239_v23 = vpop.trf.xlu0 }
 0x108   : > { %272 = vst.msk [vmem:[%s665_s25 + $0xa8] sm:$0xff] %vm250_vm0, %v239_v23 }
 0x10b   : > { %v240_v24 = vpop.trf.xlu0 }
 0x10c   : > { %273 = vst.msk [vmem:[%s665_s25 + $0xb0] sm:$0xff] %vm250_vm0, %v240_v24 }
 0x10f   : > { %v241_v25 = vpop.trf.xlu0 }
 0x110   : > { %274 = vst.msk [vmem:[%s665_s25 + $0xb8] sm:$0xff] %vm250_vm0, %v241_v25 }
 0x113   : > { %v242_v26 = vpop.trf.xlu0 }
 0x114   : > { %275 = vst.msk [vmem:[%s665_s25 + $0xc0] sm:$0xff] %vm250_vm0, %v242_v26 }
 0x117   : > { %v243_v27 = vpop.trf.xlu0 }
 0x118   : > { %276 = vst.msk [vmem:[%s665_s25 + $0xc8] sm:$0xff] %vm250_vm0, %v243_v27 }
 0x11b   : > { %v244_v28 = vpop.trf.xlu0 }
 0x11c   : > { %277 = vst.msk [vmem:[%s665_s25 + $0xd0] sm:$0xff] %vm250_vm0, %v244_v28 }
 0x11f   : > { %v245_v29 = vpop.trf.xlu0 }
 0x120   : > { %278 = vst.msk [vmem:[%s665_s25 + $0xd8] sm:$0xff] %vm250_vm0, %v245_v29 }
 0x123   : > { %v246_v30 = vpop.trf.xlu0 }
 0x124   : > { %279 = vst.msk [vmem:[%s665_s25 + $0xe0] sm:$0xff] %vm250_vm0, %v246_v30 }
 0x127   : > { %v247_v31 = vpop.trf.xlu0 }
 0x128   : > { %280 = vst.msk [vmem:[%s665_s25 + $0xe8] sm:$0xff] %vm250_vm0, %v247_v31 }
 0x12b   : > { %v248_v32 = vpop.trf.xlu0 }
 0x12c   : > { %281 = vst.msk [vmem:[%s665_s25 + $0xf0] sm:$0xff] %vm250_vm0, %v248_v32 }
 0x12f   : > { %v249_v33 = vpop.trf.xlu0 }
 0x130   : > { %282 = vst.msk [vmem:[%s665_s25 + $0xf8] sm:$0xff] %vm250_vm0, %v249_v33 }
 0x131 PF: > { %s14_s11 = sadd.s32 1, %s545_s11   ;;  %s756_s6 = smov %s529_s7 }
 0x132   : > { %p11_p7 = scmp.ge.s32.totalorder %s14_s11, 4   ;;  %s757_s7 = smov %s533_s8 }
 0x133   : > { %s758_s8 = smov %s607_s18  ;;  %s759_s9 = smov %s541_s10 }
 0x134   : > { %s760_s10 = smov %s762_s13  ;;  %13 = sbr.rel (!%p11_p7) target bundleno = 4 (0x4), region = 64 }
 0x13b   :  { %319 = vsyncpa [#allocation3], 1 }
 0x13c   :  { %321 = vsyncpa [#allocation3 + $0x1], 1 }

</bundles_post_ra>
